<compile_context>
chip_gen: v6e
topology: v6e:2x2x1
jax: 0.10.0
libtpu: 0.0.40
codegen_flags: <defaults>
</compile_context>

<pallas_src>
import functools

import jax
import jax.numpy as jnp
from jax.experimental import pallas as pl
from jax.experimental.pallas import tpu as pltpu


def _masked_mse_kernel(lens_ref, pred_ref, tgt_ref, out_ref, acc_ref, *,
                       max_len, tile_t):
    b = pl.program_id(0)
    t = pl.program_id(1)

    @pl.when(t == 0)
    def _init():
        acc_ref[...] = jnp.zeros_like(acc_ref)

    # Current (batch, time-tile) block: (tile_t, M), upcast in-kernel.
    pred = pred_ref[0].astype(jnp.float32)
    tgt = tgt_ref[0].astype(jnp.float32)
    d = pred - tgt

    # Global time index of each row in this tile.
    t_idx = jax.lax.broadcasted_iota(jnp.int32, d.shape, 0) + t * tile_t
    valid = t_idx <= lens_ref[b]
    if max_len % tile_t != 0:
        # Last tile extends past T (cdiv padding): mask the garbage rows too.
        valid &= t_idx < max_len

    # Pure-VPU elementwise accumulation — no per-step cross-lane reduction.
    acc_ref[...] += jnp.where(valid, d * d, jnp.float32(0.0))

    @pl.when(t == pl.num_programs(1) - 1)
    def _finalize():
        # One sublane (XLU) reduction per batch element, not per grid step.
        out_ref[...] = jnp.sum(acc_ref[...], axis=0, keepdims=True)[None]


def _choose_tile_t(max_len, n_mels, itemsize, target_block_bytes=1 << 20):
    """Time-tile: multiple of 8, each input block ~target_block_bytes."""
    rows = target_block_bytes // max(1, n_mels * itemsize)
    rows = max(8, min(rows, 2048))
    rows = (rows // 8) * 8
    if rows >= max_len:
        return max_len  # full dim -> no divisibility constraint
    return rows


def masked_mse_loss(mel_pred, mel_target, mel_lens, *, tile_t=None):
    """Pallas implementation of MaskedMSELoss.forward."""
    B, T, M = mel_pred.shape
    mel_lens = mel_lens.astype(jnp.int32)

    itemsize = jnp.dtype(mel_pred.dtype).itemsize
    if tile_t is None:
        tile_t = _choose_tile_t(T, M, itemsize)
    tile_t = min(tile_t, T)
    if tile_t < T:
        tile_t = max(8, (tile_t // 8) * 8)
    n_t = pl.cdiv(T, tile_t)

    kernel = functools.partial(_masked_mse_kernel, max_len=T, tile_t=tile_t)

    # Per-batch partial sums over (time, mel) of masked squared error.
    partial_sums = pl.pallas_call(
        kernel,
        out_shape=jax.ShapeDtypeStruct((B, 1, M), jnp.float32),
        grid_spec=pltpu.PrefetchScalarGridSpec(
            num_scalar_prefetch=1,                       # mel_lens -> SMEM
            grid=(B, n_t),
            in_specs=[
                pl.BlockSpec((1, tile_t, M), lambda b, t, lens: (b, t, 0)),
                pl.BlockSpec((1, tile_t, M), lambda b, t, lens: (b, t, 0)),
            ],
            out_specs=pl.BlockSpec((1, 1, M), lambda b, t, lens: (b, 0, 0)),
            scratch_shapes=[pltpu.VMEM((tile_t, M), jnp.float32)],
        ),
        compiler_params=pltpu.CompilerParams(
            # Batch axis parallel (both TCs on v7x, each with its own output
            # block + scratch accumulator); time axis is the reduction carry.
            dimension_semantics=("parallel", "arbitrary"),
        ),
    )(mel_lens, mel_pred, mel_target)

    # .mean() over ALL B*T*M elements (not just the unmasked ones).
    return (jnp.sum(partial_sums) / (B * T * M)).astype(jnp.float32)


def _reference(mel_pred, mel_target, mel_lens):
    B, T, M = mel_pred.shape
    idx = jnp.arange(T)[None, :]                              # (1, T)
    mask = (idx <= mel_lens[:, None]).astype(jnp.float32)     # (B, T)
    mask = jnp.broadcast_to(mask[:, :, None], (B, T, M))
    sq = (mel_pred.astype(jnp.float32) - mel_target.astype(jnp.float32)) ** 2
    return jnp.mean(sq * mask)


if __name__ == "__main__":
    key = jax.random.PRNGKey(0)
    k1, k2 = jax.random.split(key)

    # Case 1: T divisible by the tile.
    B, T, M = 2, 64, 80                  # batch, max_len, n_mels
    mel_pred = jax.random.normal(k1, (B, T, M), dtype=jnp.float32)
    mel_target = jax.random.normal(k2, (B, T, M), dtype=jnp.float32)
    mel_lens = jnp.array([37, 55], dtype=jnp.int32)

    loss = jax.block_until_ready(
        masked_mse_loss(mel_pred, mel_target, mel_lens, tile_t=16))
    ref = jax.block_until_ready(_reference(mel_pred, mel_target, mel_lens))
    assert jnp.allclose(loss, ref, rtol=1e-5, atol=1e-6), (loss, ref)

    # Case 2: ragged last time-tile (T % tile_t != 0) exercises the bound mask.
    B2, T2, M2 = 2, 60, 80
    k3, k4 = jax.random.split(k2)
    pred2 = jax.random.normal(k3, (B2, T2, M2), dtype=jnp.float32)
    tgt2 = jax.random.normal(k4, (B2, T2, M2), dtype=jnp.float32)
    lens2 = jnp.array([10, 59], dtype=jnp.int32)

    loss2 = jax.block_until_ready(
        masked_mse_loss(pred2, tgt2, lens2, tile_t=16))
    ref2 = jax.block_until_ready(_reference(pred2, tgt2, lens2))
    assert jnp.allclose(loss2, ref2, rtol=1e-5, atol=1e-6), (loss2, ref2)

    print("KERNEL_OK")
</pallas_src>

<mosaic_0001>
module attributes {stable_mosaic.version = 11 : i64} {
  func.func @_masked_mse_kernel(%arg0: i32, %arg1: i32, %arg2: memref<2xi32, #tpu.memory_space<smem>>, %arg3: memref<1x16x80xf32, #tpu.memory_space<vmem>>, %arg4: memref<1x16x80xf32, #tpu.memory_space<vmem>>, %arg5: memref<1x1x80xf32, #tpu.memory_space<vmem>>, %arg6: memref<16x80xf32, #tpu.memory_space<vmem>>) attributes {dimension_semantics = [#tpu.dimension_semantics<parallel>, #tpu.dimension_semantics<arbitrary>], iteration_bounds = array<i64: 2, 4>, scalar_prefetch = 1 : i64, scratch_operands = 1 : i64, tpu.core_type = #tpu.core_type<tc>, window_params = [{transform_indices = @transform_0, window_bounds = array<i64: 1, 16, 80>}, {transform_indices = @transform_1, window_bounds = array<i64: 1, 16, 80>}, {transform_indices = @transform_2, window_bounds = array<i64: 1, 1, 80>}]} {
    %c0_i32 = arith.constant 0 : i32
    %0 = arith.cmpi eq, %arg1, %c0_i32 : i32
    %1 = arith.extui %0 : i1 to i32
    %c0_i32_0 = arith.constant 0 : i32
    %2 = arith.cmpi ne, %1, %c0_i32_0 : i32
    scf.if %2 {
      %cst_11 = arith.constant 0.000000e+00 : f32
      %25 = vector.broadcast %cst_11 : f32 to vector<16x80xf32>
      %c0_12 = arith.constant 0 : index
      %c0_13 = arith.constant 0 : index
      %26 = vector.load %arg6[%c0_12, %c0_13] : memref<16x80xf32, #tpu.memory_space<vmem>>, vector<16x80xf32>
      tpu.vector_store %arg6[%c0_12, %c0_13], %25 {strides = array<i32>} : memref<16x80xf32, #tpu.memory_space<vmem>>, vector<16x80xf32>,
    } else {
    }
    %c0 = arith.constant 0 : index
    %c0_1 = arith.constant 0 : index
    %c0_2 = arith.constant 0 : index
    %3 = vector.load %arg3[%c0, %c0_1, %c0_2] : memref<1x16x80xf32, #tpu.memory_space<vmem>>, vector<1x16x80xf32>
    %4 = vector.shape_cast %3 : vector<1x16x80xf32> to vector<16x80xf32>
    %c0_3 = arith.constant 0 : index
    %c0_4 = arith.constant 0 : index
    %c0_5 = arith.constant 0 : index
    %5 = vector.load %arg4[%c0_3, %c0_4, %c0_5] : memref<1x16x80xf32, #tpu.memory_space<vmem>>, vector<1x16x80xf32>
    %6 = vector.shape_cast %5 : vector<1x16x80xf32> to vector<16x80xf32>
    %7 = arith.subf %4, %6 : vector<16x80xf32>
    %8 = tpu.iota {dimensions = array<i32: 0>} : vector<16x80xi32>
    %c16_i32 = arith.constant 16 : i32
    %9 = arith.muli %arg1, %c16_i32 : i32
    %10 = vector.broadcast %9 : i32 to vector<16x80xi32>
    %11 = arith.addi %8, %10 : vector<16x80xi32>
    %12 = arith.index_cast %arg0 : i32 to index
    %13 = memref.load %arg2[%12] : memref<2xi32, #tpu.memory_space<smem>>
    %14 = vector.broadcast %13 : i32 to vector<16x80xi32>
    %15 = arith.cmpi sle, %11, %14 : vector<16x80xi32>
    %c0_6 = arith.constant 0 : index
    %c0_7 = arith.constant 0 : index
    %16 = vector.load %arg6[%c0_6, %c0_7] : memref<16x80xf32, #tpu.memory_space<vmem>>, vector<16x80xf32>
    %17 = arith.mulf %7, %7 : vector<16x80xf32>
    %cst = arith.constant 0.000000e+00 : f32
    %18 = vector.broadcast %cst : f32 to vector<16x80xf32>
    %19 = arith.select %15, %17, %18 : vector<16x80xi1>, vector<16x80xf32>
    %20 = arith.addf %16, %19 : vector<16x80xf32>
    %c0_8 = arith.constant 0 : index
    %c0_9 = arith.constant 0 : index
    %21 = vector.load %arg6[%c0_8, %c0_9] : memref<16x80xf32, #tpu.memory_space<vmem>>, vector<16x80xf32>
    tpu.vector_store %arg6[%c0_8, %c0_9], %20 {strides = array<i32>} : memref<16x80xf32, #tpu.memory_space<vmem>>, vector<16x80xf32>,
    %c3_i32 = arith.constant 3 : i32
    %22 = arith.cmpi eq, %arg1, %c3_i32 : i32
    %23 = arith.extui %22 : i1 to i32
    %c0_i32_10 = arith.constant 0 : i32
    %24 = arith.cmpi ne, %23, %c0_i32_10 : i32
    scf.if %24 {
      %c0_11 = arith.constant 0 : index
      %c0_12 = arith.constant 0 : index
      %25 = vector.load %arg6[%c0_11, %c0_12] : memref<16x80xf32, #tpu.memory_space<vmem>>, vector<16x80xf32>
      %cst_13 = arith.constant dense<0.000000e+00> : vector<80xf32>
      %26 = vector.multi_reduction <add>, %25, %cst_13 [0] : vector<16x80xf32> to vector<80xf32>
      %27 = vector.shape_cast %26 : vector<80xf32> to vector<1x80xf32>
      %28 = vector.shape_cast %27 : vector<1x80xf32> to vector<1x1x80xf32>
      %c0_14 = arith.constant 0 : index
      %c0_15 = arith.constant 0 : index
      %c0_16 = arith.constant 0 : index
      %29 = vector.load %arg5[%c0_14, %c0_15, %c0_16] : memref<1x1x80xf32, #tpu.memory_space<vmem>>, vector<1x1x80xf32>
      tpu.vector_store %arg5[%c0_14, %c0_15, %c0_16], %28 {strides = array<i32>} : memref<1x1x80xf32, #tpu.memory_space<vmem>>, vector<1x1x80xf32>,
    } else {
    }
    return
  }
  func.func @transform_0(%arg0: i32, %arg1: i32, %arg2: memref<2xi32, #tpu.memory_space<smem>>) -> (i32, i32, i32) {
    %c0_i32 = arith.constant 0 : i32
    %c0_i32_0 = arith.constant 0 : i32
    return %arg0, %arg1, %c0_i32 : i32, i32, i32
  }
  func.func @transform_1(%arg0: i32, %arg1: i32, %arg2: memref<2xi32, #tpu.memory_space<smem>>) -> (i32, i32, i32) {
    %c0_i32 = arith.constant 0 : i32
    %c0_i32_0 = arith.constant 0 : i32
    return %arg0, %arg1, %c0_i32 : i32, i32, i32
  }
  func.func @transform_2(%arg0: i32, %arg1: i32, %arg2: memref<2xi32, #tpu.memory_space<smem>>) -> (i32, i32, i32) {
    %c0_i32 = arith.constant 0 : i32
    %c0_i32_0 = arith.constant 0 : i32
    %c0_i32_1 = arith.constant 0 : i32
    return %arg0, %c0_i32, %c0_i32_0 : i32, i32, i32
  }
}

</mosaic_0001>

<bundles_post_ra>
// kernel: tpu_custom_call.1
= control target key start
LH: loop header
LB: loop body
LE: loop exit
PB: predicated region body
PF: predicated region fallthrough
CT: control target
= control target key end

     0   :  { %s723_s12 = smov [#allocation4]   ;;  %s971_s0 = inlined_call_operand.hbm [shape: s32[2], index: 0, kind: input, shape index: {}]   ;;  %s972_s1 = inlined_call_operand.hbm [shape: f32[2,64,80], index: 1, kind: input, shape index: {}]   ;;  %s973_s2 = inlined_call_operand.hbm [shape: f32[2,64,80], index: 2, kind: input, shape index: {}]   ;;  %s974_s3 = inlined_call_operand.hbm [shape: f32[2,1,80], index: 3, kind: output, shape index: {}]  }
   0x1   :  { %979 = sst [smem:[#allocation20_spill]] %s972_s1 }
   0x2   :  { %9 = dma.hbm_to_smem %s971_s0, 16, %s723_s12, [#allocation3] }
   0x3   :  { %665 = dma.done.wait [#allocation3], 16 }
   0x4   :  { %666 = vsyncadd [#allocation3], 4294967280 }
   0x5   :  { %11 = sfence }
   0x6   :  { %12 = vsyncpa [#allocation6], 0 }
   0x7   :  { %14 = vsyncpa [#allocation6 + $0x1], 0 }
   0x8   :  { %15 = vsyncpa [#allocation9], 0 }
   0x9   :  { %17 = vsyncpa [#allocation9 + $0x1], 0 }
   0xa   :  { %18 = vsyncpa [#allocation7], 0 }
   0xb   :  { %20 = vsyncpa [#allocation7 + $0x1], 0  ;;  %s753_s15 = smov 0   ;;  %s755_s16 = smov 0  }
   0xc   :  { %s757_s17 = smov 0   ;;  %s759_s18 = smov 0  }
   0xd   :  { %s761_s19 = smov 0   ;;  %s763_s0 = smov 0  }
   0xe   :  { %s765_s20 = smov 0   ;;  %s767_s21 = smov 0  }
   0xf   :  { %s769_s22 = smov 0   ;;  %s771_s23 = smov 0  }
  0x10   :  { %s773_s24 = smov 0  }
  0x11 LB: > { %980 = sst [smem:[#allocation15_spill]] %s713_s22  ;;  %s399_s25 = sadd.s32 4294967295, %s721_s24   ;;  %s721_s24 = sphi %s773_s24, %s26_s24   ;;  %s717_s23 = sphi %s771_s23, %s996_s23   ;;  %s713_s22 = sphi %s769_s22, %s995_s22   ;;  %s709_s21 = sphi %s767_s21, %s994_s21   ;;  %s705_s20 = sphi %s765_s20, %s993_s20   ;;  %s701_s0 = sphi %s763_s0, %s1002_s0   ;;  %s697_s19 = sphi %s761_s19, %s1001_s19   ;;  %s693_s18 = sphi %s759_s18, %s1000_s18   ;;  %s689_s17 = sphi %s757_s17, %s999_s17   ;;  %s685_s16 = sphi %s755_s16, %s998_s16   ;;  %s681_s15 = sphi %s753_s15, %s997_s15  }
  0x12   : > { %981 = sst [smem:[#allocation16_spill]] %s717_s23  ;;  %s400_s26 = sadd.s32 4294967294, %s721_s24  }
  0x13   : > { %s35_s27 = sadd.s32 1, %s713_s22  ;;  %s38_s28 = sadd.s32 1, %s717_s23 }
  0x14   : > { %p36_p0 = scmp.ge.s32.totalorder %s35_s27, 4  ;;  %s47_s29 = sadd.s32 1, %s701_s0 }
  0x15   : > { %p54_p1 = scmp.ne.s32.totalorder %s701_s0, %s697_s19  ;;  %p55_p2 = scmp.eq.s32.totalorder %s721_s24, 0 }
  0x16   : > { %s1004_s27 = smov (%p36_p0, %s35_s27), 0  ;;  %s1006_s28 = smov (!%p36_p0, %s38_s28), %s717_s23 }
  0x17   : > { %982 = sst [smem:[#allocation17_spill]] %s1004_s27  ;;  %s43_s30 = ssub.s32 %s713_s22, %s1004_s27 }
  0x18   : > { %p819_p3 = por %p55_p2, %p54_p1  ;;  %p40_p4 = scmp.ge.s32.totalorder %s1006_s28, 2 }
  0x19   : > { %p60_p5 = scmp.ne.s32.totalorder %s697_s19, %s693_s18  ;;  %p61_p6 = scmp.eq.s32.totalorder %s399_s25, 0 }
  0x1a   : > { %s101_s5 = sadd.s32 1, %s689_s17  ;;  %s1008_s28 = smov (%p40_p4, %s1006_s28), 0 }
  0x1b   : > { %984 = sst [smem:[#allocation18_spill]] %s1008_s28  ;;  %p827_p7 = por %p61_p6, %p60_p5 }
  0x1c   : > { %p111_p8 = scmp.ne.s32.totalorder %s689_s17, %s685_s16  ;;  %s42_s7 = ssub.s32 %s717_s23, %s1008_s28 }
  0x1d   : > { %p112_p9 = scmp.eq.s32.totalorder %s399_s25, 7  ;;  %s44_s8 = sor.u32 %s43_s30, %s42_s7 }
  0x1e   : > { %p99_p10 = scmp.eq.s32.totalorder %s42_s7, 0  ;;  %p45_p11 = scmp.eq.s32.totalorder %s44_s8, 0 }
  0x1f   : > { %p835_p12 = por %p112_p9, %p111_p8  ;;  %p117_p13 = scmp.ne.s32.totalorder %s685_s16, %s681_s15 }
  0x20   : > { %s840_s10 = scalar_select %p99_p10, %s689_s17, %s101_s5  }
  0x21   : > { %s843_s11 = scalar_select %p45_p11, %s701_s0, %s47_s29  }
  0x22   : > { %p118_p0 = scmp.eq.s32.totalorder %s400_s26, 7  ;;  %p437_p1 = scmp.lt.s32.totalorder %s721_s24, 8 }
  0x23   : > { %987 = sst [smem:[#allocation19_spill]] %s843_s11  ;;  %s853_s13 = sand.u32 1, %s701_s0  }
  0x24   : > { %p848_p2 = por %p118_p0, %p117_p13  ;;  %s403_s14 = sshll.u32 %s853_s13, 4 }
  0x25   : > { %s404_s18 = sshll.u32 %s713_s22, 1  ;;  %s405_s25 = sshll.u32 %s717_s23, 3 }
  0x26   : > { %s142_s30 = scalar_lea.vmem [#allocation5], %s403_s14  ;;  %s148_s29 = sadd.s32 %s405_s25, %s404_s18 }
  0x27   : > { %s151_s5 = sshll.u32 %s142_s30, 4  ;;  %s406_s7 = sshll.u32 %s148_s29, 7  ;;  %s152_s5 = int_to_ptr.vmem [resolvable:$true] %s151_s5 }
  0x28   : > { %p862_p4 = pnand %p437_p1, %p819_p3  ;;  %s990_s1 = sld [smem:[#allocation20_spill]] }
  0x29   : > { %s139_s11 = scalar_lea.sflag [#allocation6], %s853_s13  ;;  %s552_s23 = scalar_lea.vmem %s152_s5, 256 }
  0x2a   : > { %p541_p5 = pneg %p862_p4  ;;  %p553_p6 = scmp.ne.s32.totalorder %s152_s5, %s552_s23 }
  0x2b   : > { %s724_s4 = smov [#allocation5]  }
  0x2c   : > { %p555_p8 = pnand %p553_p6, %p541_p5  ;;  %s557_s18 = sshll.u32 %s724_s4, 4  ;;  %s558_s18 = int_to_ptr.vmem [resolvable:$false] %s557_s18 }
  0x2d   : > { %s559_s25 = scalar_lea.vmem %s558_s18, 512  ;;  %p560_p3 = scmp.lt.s32.totalorder %s152_s5, %s558_s18 }
  0x2e   : > { %s150_s27 = scalar_lea.hbm %s990_s1, %s406_s7  ;;  %p556_p9 = pneg %p555_p8 }
  0x2f   : > { %p561_p10 = scmp.lt.s32.totalorder %s559_s25, %s552_s23 }
  0x31   : > { %p562_p11 = por %p561_p10, %p560_p3 }
  0x33   : > { %p563_p13 = pnand %p562_p11, %p556_p9 }
  0x35   : > { %566 = shalt.err (!%p563_p13)
}
  0x36   : > { %s725_s28 = smov 128   ;;  %s726_s30 = smov 8  }
  0x37   : > { %429 = dma.hbm_to_vmem [thread:$0]  (!%p862_p4), %s150_s27, 256, %s152_s5, %s139_s11, %s725_s28, %s725_s28, %s726_s30  }
  0x38   : > { %p411_p0 = scmp.ge.s32.totalorder %s721_s24, 1  ;;  %p182_p1 = scmp.lt.s32.totalorder %s721_s24, 9 }
  0x39   : > { %s173_s4 = scalar_lea.hbm %s973_s2, %s406_s7  ;;  %s165_s18 = scalar_lea.vmem [#allocation8], %s403_s14 }
  0x3a   : > { %p879_p6 = pnand %p411_p0, %p182_p1  ;;  %s174_s25 = sshll.u32 %s165_s18, 4  ;;  %s175_s25 = int_to_ptr.vmem [resolvable:$true] %s174_s25 }
  0x3b   : > { %s162_s1 = scalar_lea.sflag [#allocation9], %s853_s13  ;;  %s580_s22 = scalar_lea.vmem %s175_s25, 256 }
  0x3c   : > { %p581_p8 = scmp.ne.s32.totalorder %s175_s25, %s580_s22  ;;  %s727_s27 = smov [#allocation8]  }
  0x3d   : > { %s585_s11 = sshll.u32 %s727_s27, 4  ;;  %s586_s11 = int_to_ptr.vmem [resolvable:$false] %s585_s11 }
  0x3e   : > { %p583_p9 = pnand %p581_p8, %p541_p5  ;;  %s587_s5 = scalar_lea.vmem %s586_s11, 512 }
  0x3f   : > { %p588_p10 = scmp.lt.s32.totalorder %s175_s25, %s586_s11  ;;  %p589_p11 = scmp.lt.s32.totalorder %s587_s5, %s580_s22 }
  0x40   : > { %p584_p3 = pneg %p583_p9 }
  0x41   : > { %p590_p13 = por %p589_p11, %p588_p10 }
  0x43   : > { %p591_p0 = pnand %p590_p13, %p584_p3 }
  0x45   : > { %594 = shalt.err (!%p591_p0)
}
  0x46   : > { %432 = dma.hbm_to_vmem [thread:$0]  (!%p862_p4), %s173_s4, 256, %s175_s25, %s162_s1, %s725_s28, %s725_s28, %s726_s30  }
  0x47   : > { %186 = sbr.rel (%p879_p6) target bundleno = 147 (0x93), region = 28  ;;  %s188_s13 = sand.u32 (!%p879_p6), 1, %s697_s19  }
  0x48   : > { %s412_s14 = sshll.u32 (!%p879_p6), %s188_s13, 4  ;;  %s189_s7 = scalar_lea.sflag (!%p879_p6), [#allocation6], %s188_s13 }
  0x49   : > { %s192_s23 = scalar_lea.vmem (!%p879_p6), [#allocation5], %s412_s14 }
  0x4c   : > { %668 = dma.done.wait (%p827_p7), %s189_s7, 256  }
  0x4d   : > { %670 = vsyncadd (%p827_p7), %s189_s7, 4294967040  ;;  %s198_s22 = scalar_lea.sflag [#allocation9], %s188_s13  ;;  %s201_s8 = scalar_lea.vmem [#allocation8], %s412_s14 }
  0x4e   : > { %672 = dma.done.wait (%p827_p7), %s198_s22, 256  }
  0x4f   : > { %674 = vsyncadd (%p827_p7), %s198_s22, 4294967040  ;;  %s224_s1 = sand.u32 1, %s685_s16   ;;  %p414_p4 = scmp.ne.s32.totalorder %s705_s20, 0 }
  0x50   : > { %s908_s26 = scalar_lea.vmem [#allocation10], %s224_s1 }
  0x51   : > { %231 = sbr.rel (%p414_p4) target bundleno = 88 (0x58), region = 40 }
  0x56   : > { %vm232_vm0 = vcmask 654336   ;;  %v728_v0 = vmov 0.0  }
  0x57   : > { %233 = vst.msk [vmem:[#allocation2] sm:$0xff] %vm232_vm0, %v728_v0  ;;  %234 = vst.msk [vmem:[#allocation2 + $0x8] sm:$0xff] %vm232_vm0, %v728_v0 }
  0x58 PF: > { %v235_v1 = vld [vmem:[%s192_s23] sm:$0xff]  ;;  %v241_v3 = vlaneseq  ;;  %s415_s6 = sshll.u32 %s705_s20, 4  ;;  %s248_s28 = sld [smem:[#allocation4 + %s709_s21]]  ;;  %v236_v6 = vld [vmem:[%s192_s23 + $0x8] sm:$0xff]  ;;  %vm260_vm2 = vcmask 654336  }
  0x59   : > { %v237_v2 = vld [vmem:[%s201_s8] sm:$0xff]  ;;  %v245_v5 = vstv %s415_s6  ;;  %v238_v7 = vld [vmem:[%s201_s8 + $0x8] sm:$0xff]  ;;  %p416_p7 = scmp.ne.s32.totalorder %s705_s20, 3 }
  0x5a   : > { %v239_v4 = vsub.f32 %v235_v1, %v237_v2  ;;  %v242_v8 = vshrl.u32 %v241_v3, 7  ;;  %v240_v9 = vsub.f32 %v236_v6, %v238_v7 }
  0x5c   : > { %v246_v10 = vadd.s32 %v245_v5, %v242_v8  ;;  %v254_v11 = vmul.f32 %v239_v4, %v239_v4  ;;  %v243_v12 = vadd.s32 8, %v242_v8  ;;  %v255_v13 = vmul.f32 %v240_v9, %v240_v9 }
  0x5e   : > { %v249_v14 = vstv %s248_s28  ;;  %v252_v15 = vld [vmem:[#allocation2] sm:$0xff]  ;;  %v247_v16 = vadd.s32 %v245_v5, %v243_v12  ;;  %v253_v17 = vld [vmem:[#allocation2 + $0x8] sm:$0xff] }
  0x5f   : > { %vm250_vm1 = vcmp.le.s32.totalorder %v246_v10, %v249_v14 }
  0x60   : > { %v256_v18 = vsel %vm250_vm1, %v254_v11, 0.0  ;;  %vm251_vm3 = vcmp.le.s32.totalorder %v247_v16, %v249_v14  ;;  %266 = sbr.rel (%p416_p7) target bundleno = 124 (0x7c), region = 44 }
  0x61   : > { %v258_v19 = vadd.f32 %v256_v18, %v252_v15  ;;  %v257_v20 = vsel %vm251_vm3, %v255_v13, 0.0 }
  0x62   : > { %v259_v21 = vadd.f32 %v257_v20, %v253_v17 }
  0x63   : > { %261 = vst.msk [vmem:[#allocation2] sm:$0xff] %vm260_vm2, %v258_v19 }
  0x64   : > { %262 = vst.msk [vmem:[#allocation2 + $0x8] sm:$0xff] %vm260_vm2, %v259_v21 }
  0x65   : > { %vm278_vm4 = vcmask 647168  }
  0x6a   : > { %v267_v22 = vld [vmem:[#allocation2] sm:$0xff] }
  0x6b   : > { %v268_v23 = vld [vmem:[#allocation2 + $0x8] sm:$0xff]  ;;  %v269_v24 = vsel %vm260_vm2, %v267_v22, 0.0 }
  0x6c   : > { %v270_v25 = vsel %vm260_vm2, %v268_v23, 0.0 }
  0x6d   : > { %v271_v26 = vadd.f32 %v270_v25, %v269_v24 }
  0x6f   : > { %v272_v27 = vrot.slane %v271_v26, 4 }
  0x71   : > { %v273_v28 = vadd.f32 %v272_v27, %v271_v26 }
  0x73   : > { %v274_v29 = vrot.slane %v273_v28, 2 }
  0x75   : > { %v275_v30 = vadd.f32 %v274_v29, %v273_v28 }
  0x77   : > { %v276_v31 = vrot.slane %v275_v30, 1 }
  0x79   : > { %v277_v32 = vadd.f32 %v276_v31, %v275_v30 }
  0x7b   : > { %279 = vst.msk [vmem:[%s908_s26] sm:$0x1] %vm278_vm4, %v277_v32 }
  0x7c PF: > { %s417_s20 = sshll.u32 %s709_s21, 4  ;;  %s293_s18 = sshll.u32 %s908_s26, 4  ;;  %s294_s18 = int_to_ptr.vmem [resolvable:$true] %s293_s18 }
  0x7d   : > { %s291_s4 = scalar_lea.hbm %s974_s3, %s417_s20  ;;  %s281_s25 = scalar_lea.sflag [#allocation7], %s224_s1 }
  0x7e   : > { %s595_s27 = scalar_lea.vmem %s294_s18, 16  ;;  %s729_s11 = smov [#allocation10]  }
  0x7f   : > { %p596_p5 = scmp.ne.s32.totalorder %s294_s18, %s595_s27  ;;  %s599_s5 = sshll.u32 %s729_s11, 4  ;;  %s600_s5 = int_to_ptr.vmem [resolvable:$false] %s599_s5 }
  0x80   : > { %s601_s13 = scalar_lea.vmem %s600_s5, 32  ;;  %p602_p8 = scmp.lt.s32.totalorder %s294_s18, %s600_s5 }
  0x81   : > { %p597_p1 = pnand %p596_p5, %p835_p12  ;;  %p603_p9 = scmp.lt.s32.totalorder %s601_s13, %s595_s27 }
  0x83   : > { %p598_p6 = pneg %p597_p1  ;;  %p604_p3 = por %p603_p9, %p602_p8 }
  0x85   : > { %p605_p10 = pnand %p604_p3, %p598_p6 }
  0x87   : > { %608 = shalt.err (!%p605_p10)
}
  0x88   : > { %s609_s21 = scalar_lea.hbm %s291_s4, 16  ;;  %s613_s23 = scalar_lea.hbm %s974_s3, 32 }
  0x89   : > { %p610_p11 = scmp.ne.s32.totalorder %s291_s4, %s609_s21  ;;  %p614_p4 = scmp.lt.s32.totalorder %s291_s4, %s974_s3 }
  0x8a   : > { %p615_p7 = scmp.lt.s32.totalorder %s613_s23, %s609_s21 }
  0x8b   : > { %p611_p13 = pnand %p610_p11, %p835_p12 }
  0x8c   : > { %p616_p5 = por %p615_p7, %p614_p4 }
  0x8d   : > { %p612_p0 = pneg %p611_p13 }
  0x8f   : > { %p617_p1 = pnand %p616_p5, %p612_p0 }
  0x91   : > { %620 = shalt.err (!%p617_p1)
}
  0x92   : > { %424 = dma.vmem_to_hbm [thread:$0]  (%p835_p12), %s294_s18, 16, %s291_s4, %s281_s25  }
  0x93 PF: > { %p438_p6 = scmp.ge.s32.totalorder %s721_s24, 2  ;;  %s305_s1 = sand.u32 1, %s681_s15  }
  0x94   : > { %s306_s26 = scalar_lea.sflag [#allocation7], %s305_s1 }
  0x95   : > { %p434_p8 = pnand %p438_p6, %p848_p2 }
  0x97   : > { %p435_p9 = pneg %p434_p8 }
  0x99   : > { %676 = dma.done.wait (%p435_p9), %s306_s26, 16  }
  0x9a   : > { %678 = vsyncadd (%p435_p9), %s306_s26, 4294967280  ;;  %s26_s24 = sadd.s32 1, %s721_s24   ;;  %s992_s9 = sld [smem:[#allocation19_spill]] }
  0x9b   : > { %p23_p3 = scmp.ge.s32.totalorder %s26_s24, 10   ;;  %s993_s20 = sld [smem:[#allocation15_spill]] }
  0x9c   : > { %s994_s21 = sld [smem:[#allocation16_spill]]  ;;  %s997_s15 = smov %s685_s16 }
  0x9d   : > { %s995_s22 = sld [smem:[#allocation17_spill]]  ;;  %s998_s16 = smov %s689_s17 }
  0x9e   : > { %s996_s23 = sld [smem:[#allocation18_spill]]  ;;  %s999_s17 = smov %s840_s10 }
  0x9f   : > { %s1000_s18 = smov %s697_s19  ;;  %s1001_s19 = smov %s701_s0 }
  0xa0   : > { %s1002_s0 = smov %s992_s9  ;;  %25 = sbr.rel (!%p23_p3) target bundleno = 17 (0x11), region = 94 }
  0xa5   :  { %310 = vsyncpa [#allocation6], 1 }
  0xa6   :  { %312 = vsyncpa [#allocation6 + $0x1], 1 }
  0xa7   :  { %313 = vsyncpa [#allocation9], 1 }
  0xa8   :  { %315 = vsyncpa [#allocation9 + $0x1], 1 }
  0xa9   :  { %316 = vsyncpa [#allocation7], 1 }
  0xaa   :  { %318 = vsyncpa [#allocation7 + $0x1], 1 }

</bundles_post_ra>
